<compile_context>
chip_gen: v6e
topology: v6e:2x2x1
jax: 0.10.0
libtpu: 0.0.40
codegen_flags: <defaults>
</compile_context>

<pallas_src>
import functools

import jax
import jax.numpy as jnp
from jax.experimental import pallas as pl
from jax.experimental.pallas import tpu as pltpu


def _bert_self_output_kernel(x_ref, w_ref, b_ref, res_ref, g_ref, beta_ref,
                             ln_out_ref, dense_out_ref, *, eps):
    # Dense: x @ W.T + b. Weight is kept in PyTorch (H_out, H_in) layout and the
    # contraction is expressed directly (no wrapper-side transpose op).
    x = x_ref[...]
    w = w_ref[...]
    dense = jax.lax.dot_general(
        x, w,
        dimension_numbers=(((1,), (1,)), ((), ())),
        preferred_element_type=jnp.float32,
    ) + b_ref[...].astype(jnp.float32)
    dense_out_ref[...] = dense.astype(dense_out_ref.dtype)

    # Dropout is identity in eval mode.
    # TODO(synk): training-mode dropout (pltpu.prng_random_bits mask) not implemented.

    # Residual add + LayerNorm over the hidden (last) axis, all in f32.
    y = dense + res_ref[...].astype(jnp.float32)
    mean = jnp.mean(y, axis=-1, keepdims=True)
    centered = y - mean
    var = jnp.mean(centered * centered, axis=-1, keepdims=True)
    inv = jax.lax.rsqrt(var + eps)
    normed = (centered * inv * g_ref[...].astype(jnp.float32)
              + beta_ref[...].astype(jnp.float32))
    ln_out_ref[...] = normed.astype(ln_out_ref.dtype)


def bert_self_output(hidden_states, input_tensor, weight, bias, gamma, beta,
                     eps=1e-12, block_m=256):
    """hidden_states, input_tensor: (B, S, H). weight: (H_out, H_in) PyTorch layout."""
    B, S, H = hidden_states.shape
    M = B * S
    x2d = hidden_states.reshape(M, H)
    res2d = input_tensor.reshape(M, H)

    # Sublane packing: 8 rows for f32, 16 for bf16.
    sub = 16 if hidden_states.dtype == jnp.bfloat16 else 8
    tm = min(block_m, M)
    tm = max(sub, ((tm + sub - 1) // sub) * sub)

    # Pad the token axis up to a multiple of TM (row-independent math; padded rows
    # produce harmless values and are sliced off below).
    num_blocks = pl.cdiv(M, tm)
    M_pad = num_blocks * tm
    if M_pad != M:
        pad = M_pad - M
        x2d = jnp.pad(x2d, ((0, pad), (0, 0)))
        res2d = jnp.pad(res2d, ((0, pad), (0, 0)))

    b2d = bias.reshape(1, H)
    g2d = gamma.reshape(1, H)
    beta2d = beta.reshape(1, H)

    kernel = functools.partial(_bert_self_output_kernel, eps=eps)

    stream_spec = pl.BlockSpec((tm, H), lambda i: (i, 0))      # streamed per-tile
    resident_w = pl.BlockSpec((H, H), lambda i: (0, 0))        # weight resident
    resident_v = pl.BlockSpec((1, H), lambda i: (0, 0))        # bias/gamma/beta

    ln_out, dense_out = pl.pallas_call(
        kernel,
        out_shape=(
            jax.ShapeDtypeStruct((M_pad, H), hidden_states.dtype),
            jax.ShapeDtypeStruct((M_pad, H), hidden_states.dtype),
        ),
        grid=(num_blocks,),
        in_specs=[
            stream_spec,   # x
            resident_w,    # weight (PyTorch layout, resident across grid)
            resident_v,    # bias
            stream_spec,   # residual
            resident_v,    # gamma
            resident_v,    # beta
        ],
        out_specs=(stream_spec, stream_spec),
        compiler_params=pltpu.CompilerParams(
            dimension_semantics=("parallel",),
        ),
    )(x2d, weight, b2d, res2d, g2d, beta2d)

    if M_pad != M:
        ln_out = ln_out[:M]
        dense_out = dense_out[:M]
    return ln_out.reshape(B, S, H), dense_out.reshape(B, S, H)


def _reference(hidden_states, input_tensor, weight, bias, gamma, beta, eps=1e-12):
    dense = hidden_states @ weight.T + bias
    y = dense + input_tensor
    mean = jnp.mean(y, axis=-1, keepdims=True)
    var = jnp.mean((y - mean) ** 2, axis=-1, keepdims=True)
    ln = (y - mean) / jnp.sqrt(var + eps) * gamma + beta
    return ln, dense


if __name__ == "__main__":
    B, S, H = 2, 8, 32
    key = jax.random.PRNGKey(0)
    k1, k2, k3, k4 = jax.random.split(key, 4)

    hidden_states = jax.random.normal(k1, (B, S, H), dtype=jnp.float32)
    input_tensor = jax.random.normal(k2, (B, S, H), dtype=jnp.float32)
    # Deterministic parameter init (synthetic, not a checkpoint).
    weight = jax.random.normal(k3, (H, H), dtype=jnp.float32) * 0.02
    bias = jax.random.normal(k4, (H,), dtype=jnp.float32) * 0.02
    gamma = jnp.ones((H,), dtype=jnp.float32)
    beta = jnp.zeros((H,), dtype=jnp.float32)

    # Small block_m so the demo shapes exercise a multi-step grid (M=16, TM=8 -> 2 steps).
    ln_out, dense_out = bert_self_output(hidden_states, input_tensor,
                                         weight, bias, gamma, beta,
                                         block_m=8)
    jax.block_until_ready((ln_out, dense_out))

    ln_ref, dense_ref = _reference(hidden_states, input_tensor,
                                   weight, bias, gamma, beta)
    assert jnp.allclose(ln_out, ln_ref, atol=1e-5, rtol=1e-5)
    assert jnp.allclose(dense_out, dense_ref, atol=1e-5, rtol=1e-5)

    print("KERNEL_OK")
</pallas_src>

<mosaic_0001>
module attributes {stable_mosaic.version = 11 : i64} {
  func.func @_bert_self_output_kernel(%arg0: i32, %arg1: memref<8x32xf32, #tpu.memory_space<vmem>>, %arg2: memref<32x32xf32, #tpu.memory_space<vmem>>, %arg3: memref<1x32xf32, #tpu.memory_space<vmem>>, %arg4: memref<8x32xf32, #tpu.memory_space<vmem>>, %arg5: memref<1x32xf32, #tpu.memory_space<vmem>>, %arg6: memref<1x32xf32, #tpu.memory_space<vmem>>, %arg7: memref<8x32xf32, #tpu.memory_space<vmem>>, %arg8: memref<8x32xf32, #tpu.memory_space<vmem>>) attributes {dimension_semantics = [#tpu.dimension_semantics<parallel>], iteration_bounds = array<i64: 2>, scalar_prefetch = 0 : i64, scratch_operands = 0 : i64, tpu.core_type = #tpu.core_type<tc>, window_params = [{transform_indices = @transform_0, window_bounds = array<i64: 8, 32>}, {pipeline_mode = #tpu.pipeline_mode<synchronous>, transform_indices = @transform_1, window_bounds = array<i64: 32, 32>}, {pipeline_mode = #tpu.pipeline_mode<synchronous>, transform_indices = @transform_2, window_bounds = array<i64: 1, 32>}, {transform_indices = @transform_3, window_bounds = array<i64: 8, 32>}, {pipeline_mode = #tpu.pipeline_mode<synchronous>, transform_indices = @transform_4, window_bounds = array<i64: 1, 32>}, {pipeline_mode = #tpu.pipeline_mode<synchronous>, transform_indices = @transform_5, window_bounds = array<i64: 1, 32>}, {transform_indices = @transform_6, window_bounds = array<i64: 8, 32>}, {transform_indices = @transform_7, window_bounds = array<i64: 8, 32>}]} {
    %c0 = arith.constant 0 : index
    %c0_0 = arith.constant 0 : index
    %0 = vector.load %arg1[%c0, %c0_0] : memref<8x32xf32, #tpu.memory_space<vmem>>, vector<8x32xf32>
    %c0_1 = arith.constant 0 : index
    %c0_2 = arith.constant 0 : index
    %1 = vector.load %arg2[%c0_1, %c0_2] : memref<32x32xf32, #tpu.memory_space<vmem>>, vector<32x32xf32>
    %cst = arith.constant dense<0.000000e+00> : vector<8x32xf32>
    %2 = tpu.matmul %0, %1, %cst {dimension_numbers = #tpu.dot_dimension_numbers<[1], [1], [0], [0], [0, 0, 1, 0], [], []>} : vector<8x32xf32>, vector<32x32xf32>, vector<8x32xf32> -> vector<8x32xf32>
    %c0_3 = arith.constant 0 : index
    %c0_4 = arith.constant 0 : index
    %3 = vector.load %arg3[%c0_3, %c0_4] : memref<1x32xf32, #tpu.memory_space<vmem>>, vector<1x32xf32>
    %4 = vector.broadcast %3 : vector<1x32xf32> to vector<8x32xf32>
    %5 = arith.addf %2, %4 : vector<8x32xf32>
    %c0_5 = arith.constant 0 : index
    %c0_6 = arith.constant 0 : index
    %6 = vector.load %arg8[%c0_5, %c0_6] : memref<8x32xf32, #tpu.memory_space<vmem>>, vector<8x32xf32>
    tpu.vector_store %arg8[%c0_5, %c0_6], %5 {strides = array<i32>} : memref<8x32xf32, #tpu.memory_space<vmem>>, vector<8x32xf32>,
    %c0_7 = arith.constant 0 : index
    %c0_8 = arith.constant 0 : index
    %7 = vector.load %arg4[%c0_7, %c0_8] : memref<8x32xf32, #tpu.memory_space<vmem>>, vector<8x32xf32>
    %8 = arith.addf %5, %7 : vector<8x32xf32>
    %cst_9 = arith.constant dense<0.000000e+00> : vector<8xf32>
    %9 = vector.multi_reduction <add>, %8, %cst_9 [1] : vector<8x32xf32> to vector<8xf32>
    %10 = vector.shape_cast %9 : vector<8xf32> to vector<8x1xf32>
    %cst_10 = arith.constant 3.200000e+01 : f32
    %11 = vector.broadcast %cst_10 : f32 to vector<8x1xf32>
    %12 = arith.divf %10, %11 : vector<8x1xf32>
    %13 = vector.broadcast %12 : vector<8x1xf32> to vector<8x32xf32>
    %14 = arith.subf %8, %13 : vector<8x32xf32>
    %15 = arith.mulf %14, %14 : vector<8x32xf32>
    %cst_11 = arith.constant dense<0.000000e+00> : vector<8xf32>
    %16 = vector.multi_reduction <add>, %15, %cst_11 [1] : vector<8x32xf32> to vector<8xf32>
    %17 = vector.shape_cast %16 : vector<8xf32> to vector<8x1xf32>
    %cst_12 = arith.constant 3.200000e+01 : f32
    %18 = vector.broadcast %cst_12 : f32 to vector<8x1xf32>
    %19 = arith.divf %17, %18 : vector<8x1xf32>
    %cst_13 = arith.constant 9.99999996E-13 : f32
    %20 = vector.broadcast %cst_13 : f32 to vector<8x1xf32>
    %21 = arith.addf %19, %20 : vector<8x1xf32>
    %22 = math.rsqrt %21 : vector<8x1xf32>
    %23 = vector.broadcast %22 : vector<8x1xf32> to vector<8x32xf32>
    %24 = arith.mulf %14, %23 : vector<8x32xf32>
    %c0_14 = arith.constant 0 : index
    %c0_15 = arith.constant 0 : index
    %25 = vector.load %arg5[%c0_14, %c0_15] : memref<1x32xf32, #tpu.memory_space<vmem>>, vector<1x32xf32>
    %26 = vector.broadcast %25 : vector<1x32xf32> to vector<8x32xf32>
    %27 = arith.mulf %24, %26 : vector<8x32xf32>
    %c0_16 = arith.constant 0 : index
    %c0_17 = arith.constant 0 : index
    %28 = vector.load %arg6[%c0_16, %c0_17] : memref<1x32xf32, #tpu.memory_space<vmem>>, vector<1x32xf32>
    %29 = vector.broadcast %28 : vector<1x32xf32> to vector<8x32xf32>
    %30 = arith.addf %27, %29 : vector<8x32xf32>
    %c0_18 = arith.constant 0 : index
    %c0_19 = arith.constant 0 : index
    %31 = vector.load %arg7[%c0_18, %c0_19] : memref<8x32xf32, #tpu.memory_space<vmem>>, vector<8x32xf32>
    tpu.vector_store %arg7[%c0_18, %c0_19], %30 {strides = array<i32>} : memref<8x32xf32, #tpu.memory_space<vmem>>, vector<8x32xf32>,
    return
  }
  func.func @transform_0(%arg0: i32) -> (i32, i32) {
    %c0_i32 = arith.constant 0 : i32
    %c0_i32_0 = arith.constant 0 : i32
    return %arg0, %c0_i32 : i32, i32
  }
  func.func @transform_1(%arg0: i32) -> (i32, i32) {
    %c0_i32 = arith.constant 0 : i32
    %c0_i32_0 = arith.constant 0 : i32
    %c0_i32_1 = arith.constant 0 : i32
    return %c0_i32, %c0_i32_0 : i32, i32
  }
  func.func @transform_2(%arg0: i32) -> (i32, i32) {
    %c0_i32 = arith.constant 0 : i32
    %c0_i32_0 = arith.constant 0 : i32
    %c0_i32_1 = arith.constant 0 : i32
    return %c0_i32, %c0_i32_0 : i32, i32
  }
  func.func @transform_3(%arg0: i32) -> (i32, i32) {
    %c0_i32 = arith.constant 0 : i32
    %c0_i32_0 = arith.constant 0 : i32
    return %arg0, %c0_i32 : i32, i32
  }
  func.func @transform_4(%arg0: i32) -> (i32, i32) {
    %c0_i32 = arith.constant 0 : i32
    %c0_i32_0 = arith.constant 0 : i32
    %c0_i32_1 = arith.constant 0 : i32
    return %c0_i32, %c0_i32_0 : i32, i32
  }
  func.func @transform_5(%arg0: i32) -> (i32, i32) {
    %c0_i32 = arith.constant 0 : i32
    %c0_i32_0 = arith.constant 0 : i32
    %c0_i32_1 = arith.constant 0 : i32
    return %c0_i32, %c0_i32_0 : i32, i32
  }
  func.func @transform_6(%arg0: i32) -> (i32, i32) {
    %c0_i32 = arith.constant 0 : i32
    %c0_i32_0 = arith.constant 0 : i32
    return %arg0, %c0_i32 : i32, i32
  }
  func.func @transform_7(%arg0: i32) -> (i32, i32) {
    %c0_i32 = arith.constant 0 : i32
    %c0_i32_0 = arith.constant 0 : i32
    return %arg0, %c0_i32 : i32, i32
  }
}

</mosaic_0001>

<bundles_post_ra>
// kernel: tpu_custom_call.1
= control target key start
LH: loop header
LB: loop body
LE: loop exit
PB: predicated region body
PF: predicated region fallthrough
CT: control target
= control target key end

     0   :  { %s1257_s0 = inlined_call_operand.hbm [shape: f32[16,32], index: 0, kind: input, shape index: {}]   ;;  %s1258_s1 = inlined_call_operand.hbm [shape: f32[32,32], index: 1, kind: input, shape index: {}]   ;;  %s1259_s2 = inlined_call_operand.vmem [shape: f32[1,32], index: 2, kind: input, shape index: {}]   ;;  %s1260_s3 = inlined_call_operand.hbm [shape: f32[16,32], index: 3, kind: input, shape index: {}]   ;;  %s1261_s4 = inlined_call_operand.vmem [shape: f32[1,32], index: 4, kind: input, shape index: {}]   ;;  %s1262_s5 = inlined_call_operand.vmem [shape: f32[1,32], index: 5, kind: input, shape index: {}]   ;;  %s1263_s6 = inlined_call_operand.hbm [shape: f32[16,32], index: 6, kind: output, shape index: {0}]   ;;  %s1264_s7 = inlined_call_operand.hbm [shape: f32[16,32], index: 7, kind: output, shape index: {1}]  }
   0x1   :  { %1272 = sst [smem:[#allocation18_spill]] %s1257_s0 }
   0x2   :  { %13 = vsyncpa [#allocation3], 0 }
   0x3   :  { %15 = vsyncpa [#allocation3 + $0x1], 0 }
   0x4   :  { %16 = vsyncpa [#allocation6], 0 }
   0x5   :  { %17 = vsyncpa [#allocation4], 0 }
   0x6   :  { %19 = vsyncpa [#allocation4 + $0x1], 0 }
   0x7   :  { %20 = vsyncpa [#allocation10], 0 }
   0x8   :  { %22 = vsyncpa [#allocation10 + $0x1], 0  ;;  %s1002_s24 = smov 0   ;;  %s1004_s25 = smov 0  }
   0x9   :  { %s1006_s26 = smov 0   ;;  %s1008_s27 = smov 0  }
   0xa LB: > { %1273 = sst [smem:[#allocation16_spill]] %s947_s26  ;;  %s1023_s28 = sadd.s32 1, %s951_s27   ;;  %s951_s27 = sphi %s1008_s27, %s1295_s27   ;;  %s947_s26 = sphi %s1006_s26, %s1292_s26   ;;  %s943_s25 = sphi %s1004_s25, %s1294_s25   ;;  %s939_s24 = sphi %s1002_s24, %s1293_s24  }
   0xb   : > { %s35_s29 = sadd.s32 1, %s947_s26  ;;  %s32_s30 = ssub.s32 %s951_s27, %s1023_s28 }
   0xc   : > { %p1265_p0 = scmp.ne.s32.totalorder %s947_s26, %s943_s25  ;;  %p33_p1 = scmp.eq.s32.totalorder %s32_s30, 0 }
   0xd   : > { %p43_p2 = scmp.eq.s32.totalorder %s951_s27, 0  ;;  %p725_p4 = scmp.lt.s32.totalorder %s951_s27, 2 }
   0xe   : > { %s1034_s8 = scalar_select %p33_p1, %s947_s26, %s35_s29  }
   0xf   : > { %p44_p5 = por %p43_p2, %p1265_p0  ;;  %s256_s9 = sand.u32 1, %s951_s27  }
  0x10   : > { %1274 = sst [smem:[#allocation17_spill]] %s1034_s8  ;;  %s258_s10 = sand.u32 1, %s947_s26  }
  0x11   : > { %s1041_s11 = sshll.u32 %s258_s10, 3  ;;  %s655_s12 = sshll.u32 %s951_s27, 7 }
  0x12   : > { %s1275_s0 = sld [smem:[#allocation18_spill]]  ;;  %s260_s16 = scalar_lea.vmem [#allocation2], %s1041_s11 }
  0x13   : > { %s267_s17 = sshll.u32 %s260_s16, 4  ;;  %p1052_p6 = pnand %p725_p4, %p44_p5  ;;  %s268_s17 = int_to_ptr.vmem [resolvable:$true] %s267_s17 }
  0x14   : > { %s1056_s19 = scalar_lea.sflag [#allocation3], %s256_s9 }
  0x15   : > { %p769_p8 = pneg %p1052_p6 }
  0x18   : > { %s1049_s15 = scalar_lea.hbm %s1275_s0, %s655_s12  ;;  %s772_s23 = scalar_lea.hbm %s1275_s0, 256 }
  0x19   : > { %s767_s20 = scalar_lea.hbm %s1049_s15, 128  ;;  %p773_p11 = scmp.lt.s32.totalorder %s1049_s15, %s1275_s0 }
  0x1a   : > { %p768_p7 = scmp.ne.s32.totalorder %s1049_s15, %s767_s20  ;;  %p774_p12 = scmp.lt.s32.totalorder %s772_s23, %s767_s20 }
  0x1c   : > { %p770_p9 = pnand %p769_p8, %p768_p7  ;;  %p775_p13 = por %p774_p12, %p773_p11 }
  0x1e   : > { %p771_p10 = pneg %p770_p9 }
  0x20   : > { %p776_p1 = pnand %p775_p13, %p771_p10 }
  0x22   : > { %779 = shalt.err (!%p776_p1)
}
  0x23   : > { %s780_s9 = scalar_lea.vmem %s268_s17, 128  ;;  %s953_s10 = smov [#allocation2]  }
  0x24   : > { %p781_p2 = scmp.ne.s32.totalorder %s268_s17, %s780_s9  ;;  %s785_s13 = sshll.u32 %s953_s10, 4  ;;  %s786_s13 = int_to_ptr.vmem [resolvable:$false] %s785_s13 }
  0x25   : > { %s787_s14 = scalar_lea.vmem %s786_s13, 256  ;;  %p788_p7 = scmp.lt.s32.totalorder %s268_s17, %s786_s13 }
  0x26   : > { %p783_p4 = pnand %p781_p2, %p769_p8  ;;  %p789_p9 = scmp.lt.s32.totalorder %s787_s14, %s780_s9 }
  0x28   : > { %p784_p5 = pneg %p783_p4  ;;  %p790_p3 = por %p789_p9, %p788_p7 }
  0x2a   : > { %p791_p0 = pnand %p790_p3, %p784_p5 }
  0x2c   : > { %794 = shalt.err (!%p791_p0)
}
  0x2d   : > { %713 = dma.hbm_to_vmem [thread:$0]  (!%p1052_p6), %s1049_s15, 128, %s268_s17, %s1056_s19  }
  0x2e   : > { %s1080_s16 = sadd.s32 4294967295, %s951_s27   ;;  %s650_s20 = sadd.s32 4294967294, %s951_s27  }
  0x2f   : > { %p48_p0 = scmp.ne.s32.totalorder %s943_s25, %s939_s24  ;;  %p1266_p3 = scmp.eq.s32.totalorder %s1080_s16, 0 }
  0x30   : > { %p182_p10 = scmp.eq.s32.totalorder %s1080_s16, 1  ;;  %p188_p11 = scmp.eq.s32.totalorder %s650_s20, 1 }
  0x31   : > { %p1089_p12 = por %p1266_p3, %p48_p0  ;;  %p651_p13 = scmp.ge.s32.totalorder %s951_s27, 1 }
  0x32   : > { %p1278_p1 = scmp.ne.s32.totalorder %s947_s26, %s943_s25  ;;  %p1101_p4 = por %p188_p11, %p48_p0 }
  0x33   : > { %s1277_s21 = scalar_select %p1089_p12, 1, 0 }
  0x34   : > { %p1097_p2 = por %p182_p10, %p1278_p1  ;;  %p221_p5 = scmp.lt.s32.totalorder %s951_s27, 3 }
  0x35   : > { %s1280_s17 = scalar_select %p1101_p4, 1, 0 }
  0x36   : > { %s1279_s15 = scalar_select %p1097_p2, 1, 0 }
  0x37   : > { %p1106_p7 = pnand %p651_p13, %p221_p5  ;;  %s954_s23 = smov [#allocation5]  }
  0x38   : > { %s233_s29 = sshll.u32 %s954_s23, 4  ;;  %s1115_s10 = scalar_lea.hbm %s1260_s3, %s655_s12  ;;  %s1120_s29 = int_to_ptr.vmem [resolvable:$true] %s233_s29 }
  0x39   : > { %s1281_s22 = scalar_select %p1106_p7, 1, 0 }
  0x3a   : > { %p706_p9 = pneg %p1106_p7  ;;  %s278_s13 = scalar_lea.vmem [#allocation7], %s1041_s11 }
  0x3b   : > { %s285_s14 = sshll.u32 %s278_s13, 4  ;;  %s795_s23 = scalar_lea.hbm %s1115_s10, 128  ;;  %s286_s14 = int_to_ptr.vmem [resolvable:$true] %s285_s14 }
  0x3c   : > { %p1124_p0 = pnand %p706_p9, %p1266_p3  ;;  %p796_p10 = scmp.ne.s32.totalorder %s1115_s10, %s795_s23 }
  0x3d   : > { %s800_s9 = scalar_lea.hbm %s1260_s3, 256  ;;  %p801_p1 = scmp.lt.s32.totalorder %s1115_s10, %s1260_s3 }
  0x3e   : > { %s1282_s20 = scalar_select %p1124_p0, 1, 0 }
  0x3f   : > { %p798_p11 = pnand %p796_p10, %p769_p8  ;;  %p802_p5 = scmp.lt.s32.totalorder %s800_s9, %s795_s23 }
  0x41   : > { %p799_p13 = pneg %p798_p11  ;;  %p803_p4 = por %p802_p5, %p801_p1 }
  0x43   : > { %p804_p9 = pnand %p803_p4, %p799_p13 }
  0x45   : > { %807 = shalt.err (!%p804_p9)
}
  0x46   : > { %s808_s0 = scalar_lea.vmem %s286_s14, 128  ;;  %s955_s8 = smov [#allocation7]  }
  0x47   : > { %p809_p3 = scmp.ne.s32.totalorder %s286_s14, %s808_s0  ;;  %s813_s26 = sshll.u32 %s955_s8, 4  ;;  %s814_s26 = int_to_ptr.vmem [resolvable:$false] %s813_s26 }
  0x48   : > { %s815_s12 = scalar_lea.vmem %s814_s26, 256  ;;  %p816_p11 = scmp.lt.s32.totalorder %s286_s14, %s814_s26 }
  0x49   : > { %p811_p2 = pnand %p809_p3, %p769_p8  ;;  %p817_p12 = scmp.lt.s32.totalorder %s815_s12, %s808_s0 }
  0x4b   : > { %p812_p10 = pneg %p811_p2  ;;  %p818_p7 = por %p817_p12, %p816_p11 }
  0x4d   : > { %p819_p0 = pnand %p818_p7, %p812_p10 }
  0x4f   : > { %822 = shalt.err (!%p819_p0)
}
  0x50   : > { %716 = dma.hbm_to_vmem [thread:$0]  (!%p1052_p6), %s1115_s10, 128, %s286_s14, %s1056_s19  }
  0x51   : > { %p1283_p8 = scmp.ne.s32.totalorder %s1282_s20, 0  ;;  %s834_s23 = scalar_lea.vmem %s1120_s29, 512 }
  0x52   : > { %p835_p2 = scmp.ne.s32.totalorder %s1120_s29, %s834_s23  ;;  %p842_p1 = scmp.lt.s32.totalorder %s1120_s29, %s1120_s29 }
  0x53   : > { %p825_p3 = pneg %p1283_p8  ;;  %p843_p12 = scmp.lt.s32.totalorder %s834_s23, %s834_s23 }
  0x55   : > { %p837_p4 = pnand %p835_p2, %p825_p3  ;;  %p844_p7 = por %p843_p12, %p842_p1 }
  0x57   : > { %p838_p13 = pneg %p837_p4 }
  0x59   : > { %p845_p0 = pnand %p844_p7, %p838_p13 }
  0x5b   : > { %848 = shalt.err (!%p845_p0)
}
  0x5c   : > { %s956_s0 = smov 128   ;;  %s957_s26 = smov 8  }
  0x5d   : > { %709 = dma.hbm_to_vmem [thread:$0]  (!%p1283_p8), %s1258_s1, 512, %s1120_s29, [#allocation6], %s956_s0, %s956_s0, %s957_s26  }
  0x5e   : > { %p1284_p6 = scmp.ne.s32.totalorder %s1281_s22, 0 }
  0x5f   : > { %s296_s19 = sand.u32 (!%p1284_p6), 1, %s1080_s16   ;;  %s1163_s10 = sand.u32 (!%p1284_p6), 1, %s943_s25  }
  0x60   : > { %294 = sbr.rel (%p1284_p6) target bundleno = 643 (0x283), region = 44  ;;  %s1166_s14 = sshll.u32 (!%p1284_p6), %s1163_s10, 3 }
  0x61   : > { %s297_s30 = scalar_lea.sflag (!%p1284_p6), [#allocation3], %s296_s19  ;;  %s300_s9 = scalar_lea.vmem (!%p1284_p6), [#allocation2], %s1166_s14 }
  0x62   : > { %p1285_p5 = scmp.ne.s32.totalorder (!%p1284_p6), %s1277_s21, 0 }
  0x65   : > { %918 = dma.done.wait (%p1285_p5), %s297_s30, 128  }
  0x66   : > { %920 = vsyncadd (%p1285_p5), %s297_s30, 4294967168  ;;  %p1286_p9 = scmp.eq.s32.totalorder %s1080_s16, 0 }
  0x68   : > { %922 = dma.done.wait (%p1286_p9), [#allocation6], 512   ;;  %p1287_p10 = pmov %p1286_p9 }
  0x69   : > { %s313_s22 = scalar_lea.vmem [#allocation7], %s1166_s14 }
  0x6a   : > { %924 = vsyncadd (%p1287_p10), [#allocation6], 4294966784 }
  0x6b   : > { %926 = dma.done.wait (%p1285_p5), %s297_s30, 128  }
  0x6c   : > { %928 = vsyncadd (%p1285_p5), %s297_s30, 4294967168  ;;  %v958_v0 = vmov 0.0   ;;  %vm959_vm0 = vmmov 0   ;;  %vm366_vm1 = vcmask 261120   ;;  %v358_v1 = vld [vmem:[#allocation5 + $0x18] sm:$0xff]  ;;  %v357_v2 = vld [vmem:[#allocation5 + $0x10] sm:$0xff] }
  0x6d   : > { %683 = vmatprep.subr.mxu0 %v958_v0  ;;  %691 = vmatprep.mubr.msk.f32.mxu0 %vm959_vm0, %v958_v0  ;;  %v356_v3 = vld [vmem:[#allocation5 + $0x8] sm:$0xff]  ;;  %v355_v4 = vld [vmem:[#allocation5] sm:$0xff]  ;;  %v354_v5 = vld [vmem:[%s300_s9] sm:$0xff]  ;;  %s353_s20 = scalar_lea.vmem [#allocation9], %s1166_s14  ;;  %s674_s11 = sshll.u32 %s1080_s16, 7 }
  0x6e   : > { %684 = vmatpush3.xpose.msk.msra.mxu0 %vm366_vm1, %v358_v1  ;;  %v664_v6 = vld [vmem:[%s1259_s2] ss:$0 sm:$0xff]  ;;  %v453_v8 = vld [vmem:[%s313_s22] sm:$0xff]  ;;  %s516_s23 = scalar_lea.hbm %s1264_s7, %s674_s11  ;;  %s518_s0 = sshll.u32 %s353_s20, 4  ;;  %s519_s0 = int_to_ptr.vmem [resolvable:$true] %s518_s0 }
  0x6f   : > { %685 = vmatprep.subr.mxu0 %v958_v0  ;;  %s492_s26 = scalar_lea.sflag [#allocation10], %s1163_s10  ;;  %s849_s8 = scalar_lea.vmem %s519_s0, 128 }
  0x70   : > { %p850_p11 = scmp.ne.s32.totalorder %s519_s0, %s849_s8  ;;  %p1288_p8 = scmp.ne.s32.totalorder %s1279_s15, 0 }
  0x71   : > { %s960_s18 = smov [#allocation9]  }
  0x72   : > { %686 = vmatpush3.xpose.msk.msra.mxu0 %vm366_vm1, %v357_v2  ;;  %p851_p3 = pnand %p850_p11, %p1288_p8  ;;  %s853_s19 = sshll.u32 %s960_s18, 4  ;;  %s854_s19 = int_to_ptr.vmem [resolvable:$false] %s853_s19 }
  0x73   : > { %687 = vmatprep.subr.mxu0 %v958_v0  ;;  %s855_s30 = scalar_lea.vmem %s854_s19, 256  ;;  %p856_p4 = scmp.lt.s32.totalorder %s519_s0, %s854_s19 }
  0x74   : > { %p852_p2 = pneg %p851_p3  ;;  %p857_p13 = scmp.lt.s32.totalorder %s855_s30, %s849_s8 }
  0x76   : > { %688 = vmatpush3.xpose.msk.msra.mxu0 %vm366_vm1, %v356_v3  ;;  %p858_p1 = por %p857_p13, %p856_p4 }
  0x77   : > { %689 = vmatprep.subr.mxu0 %v958_v0 }
  0x78   : > { %p859_p12 = pnand %p858_p1, %p852_p2 }
  0x7a   : > { %690 = vmatpush3.xpose.msk.msra.mxu0 %vm366_vm1, %v355_v4 }
  0x7d   : > { %692 = vmatmul.mubr.msk.f32.vlgmr.msra.gmra.mxu0 %vm366_vm1, %v354_v5 }
 0x13d   : > { %v448_v7 = vpop.f32.mrf.mxu0 }
 0x13e   : > { %v449_v9 = vadd.f32 %v664_v6, %v448_v7 }
 0x13f   : > { %v693_v10 = vpop.f32.mrf.mxu0 }
 0x140   : > { %v454_v11 = vadd.f32 %v453_v8, %v449_v9  ;;  %452 = vst.msk [vmem:[%s353_s20] sm:$0xff] %vm366_vm1, %v449_v9 }
 0x142   : > { %v455_v12 = vsel %vm366_vm1, %v454_v11, 0.0 }
 0x143   : > { %456 = vadd.xlane.f32.xlu0 %v455_v12 }
 0x1cc   : > { %v457_v13 = vpop.xlane.xlu0 %456 }
 0x1cd   : > { %v459_v14 = vmul.f32 0.03125, %v457_v13 }
 0x1cf   : > { %v460_v15 = vsub.f32 %v454_v11, %v459_v14 }
 0x1d1   : > { %v461_v16 = vmul.f32 %v460_v15, %v460_v15 }
 0x1d3   : > { %v462_v17 = vsel %vm366_vm1, %v461_v16, 0.0 }
 0x1d4   : > { %463 = vadd.xlane.f32.xlu0 %v462_v17 }
 0x1d5   : > { %862 = shalt.err (!%p859_p12)
}
 0x1d6   : > { %s863_s9 = scalar_lea.hbm %s516_s23, 128  ;;  %s867_s29 = scalar_lea.hbm %s1264_s7, 256 }
 0x1d7   : > { %p864_p7 = scmp.ne.s32.totalorder %s516_s23, %s863_s9  ;;  %p868_p5 = scmp.lt.s32.totalorder %s516_s23, %s1264_s7 }
 0x1d8   : > { %p869_p9 = scmp.lt.s32.totalorder %s867_s29, %s863_s9 }
 0x1d9   : > { %p865_p0 = pnand %p864_p7, %p1288_p8 }
 0x1da   : > { %p870_p10 = por %p869_p9, %p868_p5 }
 0x1db   : > { %p866_p6 = pneg %p865_p0 }
 0x1dd   : > { %p871_p11 = pnand %p870_p10, %p866_p6 }
 0x1df   : > { %874 = shalt.err (!%p871_p11)
}
 0x1e0   : > { %703 = dma.vmem_to_hbm [thread:$0]  (%p1288_p8), %s519_s0, 128, %s516_s23, %s492_s26   ;;  %v670_v22 = vld [vmem:[%s1261_s4] ss:$0 sm:$0xff] }
 0x1e1   : > { %v671_v24 = vld [vmem:[%s1262_s5] ss:$0 sm:$0xff]  ;;  %s346_s30 = scalar_lea.vmem [#allocation8], %s1166_s14  ;;  %s503_s26 = scalar_lea.hbm %s1263_s6, %s674_s11 }
 0x1e2   : > { %s505_s9 = sshll.u32 %s346_s30, 4  ;;  %s487_s22 = scalar_lea.sflag [#allocation4], %s1163_s10  ;;  %s506_s9 = int_to_ptr.vmem [resolvable:$true] %s505_s9 }
 0x1e3   : > { %s875_s21 = scalar_lea.vmem %s506_s9, 128  ;;  %s961_s29 = smov [#allocation8]  }
 0x1e4   : > { %p876_p3 = scmp.ne.s32.totalorder %s506_s9, %s875_s21  ;;  %s879_s20 = sshll.u32 %s961_s29, 4  ;;  %s880_s20 = int_to_ptr.vmem [resolvable:$false] %s879_s20 }
 0x1e5   : > { %s881_s14 = scalar_lea.vmem %s880_s20, 256  ;;  %p882_p13 = scmp.lt.s32.totalorder %s506_s9, %s880_s20 }
 0x1e6   : > { %p877_p2 = pnand %p876_p3, %p1288_p8  ;;  %p883_p1 = scmp.lt.s32.totalorder %s881_s14, %s875_s21 }
 0x1e8   : > { %p878_p4 = pneg %p877_p2  ;;  %p884_p12 = por %p883_p1, %p882_p13 }
 0x1ea   : > { %p885_p7 = pnand %p884_p12, %p878_p4 }
 0x25d   : > { %v464_v18 = vpop.xlane.xlu0 %463 }
 0x25e   : > { %v465_v19 = vmul.f32 0.03125, %v464_v18 }
 0x260   : > { %v466_v20 = vadd.f32 1e-12, %v465_v19 }
 0x262   : > { %765 = vrsqrt.f32 %v466_v20 }
 0x26f   : > { %v766_v21 = vpop.eup %765 }
 0x270   : > { %v468_v23 = vmul.f32 %v766_v21, %v460_v15 }
 0x272   : > { %v476_v25 = vmul.f32 %v670_v22, %v468_v23 }
 0x274   : > { %v484_v26 = vadd.f32 %v671_v24, %v476_v25 }
 0x276   : > { %485 = vst.msk [vmem:[%s346_s30] sm:$0xff] %vm366_vm1, %v484_v26 }
 0x277   : > { %888 = shalt.err (!%p885_p7)
}
 0x278   : > { %s889_s16 = scalar_lea.hbm %s503_s26, 128  ;;  %s893_s13 = scalar_lea.hbm %s1263_s6, 256 }
 0x279   : > { %p890_p0 = scmp.ne.s32.totalorder %s503_s26, %s889_s16  ;;  %p894_p9 = scmp.lt.s32.totalorder %s503_s26, %s1263_s6 }
 0x27a   : > { %p895_p10 = scmp.lt.s32.totalorder %s893_s13, %s889_s16 }
 0x27b   : > { %p891_p6 = pnand %p890_p0, %p1288_p8 }
 0x27c   : > { %p896_p11 = por %p895_p10, %p894_p9 }
 0x27d   : > { %p892_p5 = pneg %p891_p6 }
 0x27f   : > { %p897_p3 = pnand %p896_p11, %p892_p5 }
 0x281   : > { %900 = shalt.err (!%p897_p3)
}
 0x282   : > { %702 = dma.vmem_to_hbm [thread:$0]  (%p1288_p8), %s506_s9, 128, %s503_s26, %s487_s22  }
 0x283 PF: > { %s530_s18 = sand.u32 1, %s939_s24   ;;  %p1289_p2 = scmp.ne.s32.totalorder %s1280_s17, 0 }
 0x284   : > { %p1290_p4 = scmp.ge.s32.totalorder %s951_s27, 2  ;;  %s531_s19 = scalar_lea.sflag [#allocation4], %s530_s18 }
 0x286   : > { %p718_p13 = pnand %p1290_p4, %p1289_p2 }
 0x288   : > { %p719_p1 = pneg %p718_p13 }
 0x28a   : > { %930 = dma.done.wait (%p719_p1), %s531_s19, 128  }
 0x28b   : > { %932 = vsyncadd (%p719_p1), %s531_s19, 4294967168  ;;  %s540_s30 = scalar_lea.sflag [#allocation10], %s530_s18 }
 0x28c   : > { %934 = dma.done.wait (%p719_p1), %s540_s30, 128  }
 0x28d   : > { %936 = vsyncadd (%p719_p1), %s540_s30, 4294967168  ;;  %s1291_s23 = sld [smem:[#allocation16_spill]]  ;;  %p25_p8 = scmp.ge.s32.totalorder %s1023_s28, 4  }
 0x28e   : > { %s1292_s26 = sld [smem:[#allocation17_spill]]  ;;  %s1293_s24 = smov %s943_s25 }
 0x28f   : > { %s1295_s27 = smov %s1023_s28  ;;  %27 = sbr.rel (!%p25_p8) target bundleno = 10 (0xa), region = 121 }
 0x293   : > { %s1294_s25 = smov %s1291_s23 }
 0x294   :  { %545 = vsyncpa [#allocation3], 1 }
 0x295   :  { %547 = vsyncpa [#allocation3 + $0x1], 1 }
 0x296   :  { %548 = vsyncpa [#allocation6], 1 }
 0x297   :  { %549 = vsyncpa [#allocation4], 1 }
 0x298   :  { %551 = vsyncpa [#allocation4 + $0x1], 1 }
 0x299   :  { %552 = vsyncpa [#allocation10], 1 }
 0x29a   :  { %554 = vsyncpa [#allocation10 + $0x1], 1 }

</bundles_post_ra>
